<compile_context>
chip_gen: v7x
topology: tpu7x:2x2x1
jax: 0.10.0
libtpu: 0.0.40
codegen_flags: <defaults>
</compile_context>

<pallas_src>
import functools

import jax
import jax.numpy as jnp
from jax.experimental import pallas as pl
from jax.experimental.pallas import tpu as pltpu


def _round_up(x: int, m: int) -> int:
    return ((x + m - 1) // m) * m


def _pick_batch_tile(batch: int, cap: int = 512) -> int:
    """Power-of-two batch tile in [8, cap]; big tiles amortize grid-step overhead."""
    tm = 8
    while tm < cap and tm < batch:
        tm *= 2
    return tm


# ----------------------------- Pallas kernel ------------------------------ #
def _mlp_fused_kernel(*refs, n_layers: int):
    """refs = (x_ref, w0_ref, b0_ref, ..., w{L-1}_ref, b{L-1}_ref, o_ref).

    Computes the whole MLP for the current batch tile; intermediate activations
    never leave the core (registers / VMEM).
    """
    x_ref = refs[0]
    o_ref = refs[-1]
    h = x_ref[...]
    for li in range(n_layers):
        w_ref = refs[1 + 2 * li]          # (Din[_pad], Dout_pad)
        b_ref = refs[2 + 2 * li]          # (1, Dout_pad)
        h = jnp.dot(h, w_ref[...], preferred_element_type=jnp.float32)
        h = h + b_ref[...]
        if li + 1 != n_layers:            # ReLU after every layer except the last
            h = jnp.maximum(h, 0.0)
    o_ref[...] = h.astype(o_ref.dtype)


# --------------------------- Params / preparation --------------------------- #
def init_mlp_params(key, model_dims):
    """torch.nn.Linear-style init: W, b ~ U(-1/sqrt(fan_in), 1/sqrt(fan_in)),
    W stored (Dout, Din) like PyTorch."""
    params = []
    for i in range(len(model_dims) - 1):
        fan_in, fan_out = model_dims[i], model_dims[i + 1]
        key, kw, kb = jax.random.split(key, 3)
        bound = 1.0 / (fan_in ** 0.5)
        w = jax.random.uniform(kw, (fan_out, fan_in), jnp.float32, -bound, bound)
        b = jax.random.uniform(kb, (fan_out,), jnp.float32, -bound, bound)
        params.append((w, b))
    return params


def prepare_mlp_params(params):
    """One-time prep (outside the forward hot path):
      * transpose weights to (Din, Dout),
      * zero-pad every OUTPUT feature dim to a multiple of 128 lanes,
      * layer 0's input dim stays unpadded (contraction dim needs no lane-128,
        so the runtime input needs no padding at all); subsequent layers' input
        dims are padded to match the previous layer's padded output.

    Zero padding preserves the math exactly: padded output columns get zero
    weight/bias -> (ReLU of) 0 -> multiply zero weight rows of the next layer.
    """
    prepared = []
    prev_dout_p = None
    for li, (w, b) in enumerate(params):
        dout, din = w.shape
        din_p = din if li == 0 else prev_dout_p
        dout_p = _round_up(dout, 128)
        w_t = jnp.zeros((din_p, dout_p), jnp.float32).at[:din, :dout].set(w.T)
        b_p = jnp.zeros((1, dout_p), jnp.float32).at[0, :dout].set(b)
        prepared.append((w_t, b_p))
        prev_dout_p = dout_p
    return prepared


# -------------------------------- Forward ---------------------------------- #
def mlp_forward(prepared_params, x, out_dim):
    """x: (B, Din) unpadded.  prepared_params from prepare_mlp_params().
    Returns (B, out_dim)."""
    B, din = x.shape
    n_layers = len(prepared_params)
    assert prepared_params[0][0].shape[0] == din
    dout_p = prepared_params[-1][0].shape[1]

    # Batch tiling: no wrapper-side padding -- Pallas masks partial tail blocks.
    # Batch grid axis is "parallel" (on v7x, >=2 grid steps shard across the 2 TCs).
    tm = _pick_batch_tile(B)
    grid = (pl.cdiv(B, tm),)

    in_specs = [pl.BlockSpec((tm, din), lambda i: (i, 0))]
    operands = [x]
    # Weights/biases: constant block index (resident across all grid steps) and
    # single-buffered -> half the VMEM footprint of the default double buffer.
    resident = pl.Buffered(1)
    max_width = din
    for w_t, b_p in prepared_params:
        kin, kout = w_t.shape
        max_width = max(max_width, kout)
        in_specs.append(
            pl.BlockSpec((kin, kout), lambda i: (0, 0), pipeline_mode=resident))
        in_specs.append(
            pl.BlockSpec((1, kout), lambda i: (0, 0), pipeline_mode=resident))
        operands.extend([w_t, b_p])
    out_spec = pl.BlockSpec((tm, dout_p), lambda i: (i, 0))

    # Advisory cost estimate for the XLA scheduler.
    flops = 0
    bytes_accessed = x.size * 4 + B * dout_p * 4
    weight_bytes = 0
    for w_t, b_p in prepared_params:
        flops += 2 * B * w_t.shape[0] * w_t.shape[1]
        weight_bytes += (w_t.size + b_p.size) * 4
        bytes_accessed += (w_t.size + b_p.size) * 4

    # Explicit VMEM budget: resident weights (single-buffered) + double-buffered
    # x/out tiles + activation headroom.  Raised above v5e's 16 MiB scoped
    # default, clamped to v7x's 64 MiB physical.
    needed = (weight_bytes
              + 2 * tm * din * 4
              + 2 * tm * dout_p * 4
              + 2 * tm * max_width * 4)
    vmem_limit = int(min(max(2 * needed, 32 * 1024 * 1024), 64 * 1024 * 1024))

    out = pl.pallas_call(
        functools.partial(_mlp_fused_kernel, n_layers=n_layers),
        out_shape=jax.ShapeDtypeStruct((B, dout_p), x.dtype),
        grid=grid,
        in_specs=in_specs,
        out_specs=out_spec,
        compiler_params=pltpu.CompilerParams(
            dimension_semantics=("parallel",),
            vmem_limit_bytes=vmem_limit),
        cost_estimate=pl.CostEstimate(
            flops=flops, transcendentals=0, bytes_accessed=bytes_accessed),
    )(*operands)

    if out_dim == dout_p:
        return out
    # Strip lane padding.  (Skip this slice if the consumer can take the
    # lane-padded slab directly.)
    return out[:, :out_dim]


# ------------------------------- Reference --------------------------------- #
def mlp_reference(params, x):
    n = len(params)
    for i, (w, b) in enumerate(params):
        x = x @ w.T + b
        if (i + 1) != n:
            x = jnp.maximum(x, 0.0)
    return x


if __name__ == "__main__":
    model_dims = [32, 64, 48, 16]
    batch = 8

    key = jax.random.PRNGKey(0)
    key, kx = jax.random.split(key)
    x = jax.random.normal(kx, (batch, model_dims[0]), jnp.float32)

    params = init_mlp_params(key, model_dims)
    prepared = prepare_mlp_params(params)          # one-time, outside hot path

    out = mlp_forward(prepared, x, out_dim=model_dims[-1])
    out = jax.block_until_ready(out)

    ref = mlp_reference(params, x)
    assert out.shape == (batch, model_dims[-1])
    assert jnp.allclose(out, ref, atol=1e-4, rtol=1e-4), (
        f"max abs err {jnp.max(jnp.abs(out - ref))}")

    print("KERNEL_OK")
</pallas_src>

<mosaic_0001>
module attributes {stable_mosaic.version = 11 : i64} {
  func.func @_mlp_fused_kernel(%arg0: i32, %arg1: memref<8x32xf32, #tpu.memory_space<vmem>>, %arg2: memref<32x128xf32, #tpu.memory_space<vmem>>, %arg3: memref<1x128xf32, #tpu.memory_space<vmem>>, %arg4: memref<128x128xf32, #tpu.memory_space<vmem>>, %arg5: memref<1x128xf32, #tpu.memory_space<vmem>>, %arg6: memref<128x128xf32, #tpu.memory_space<vmem>>, %arg7: memref<1x128xf32, #tpu.memory_space<vmem>>, %arg8: memref<8x128xf32, #tpu.memory_space<vmem>>) attributes {dimension_semantics = [#tpu.dimension_semantics<parallel>], iteration_bounds = array<i64: 1>, scalar_prefetch = 0 : i64, scratch_operands = 0 : i64, tpu.core_type = #tpu.core_type<tc>, window_params = [{transform_indices = @transform_0, window_bounds = array<i64: 8, 32>}, {pipeline_mode = #tpu.pipeline_mode<synchronous>, transform_indices = @transform_1, window_bounds = array<i64: 32, 128>}, {pipeline_mode = #tpu.pipeline_mode<synchronous>, transform_indices = @transform_2, window_bounds = array<i64: 1, 128>}, {pipeline_mode = #tpu.pipeline_mode<synchronous>, transform_indices = @transform_3, window_bounds = array<i64: 128, 128>}, {pipeline_mode = #tpu.pipeline_mode<synchronous>, transform_indices = @transform_4, window_bounds = array<i64: 1, 128>}, {pipeline_mode = #tpu.pipeline_mode<synchronous>, transform_indices = @transform_5, window_bounds = array<i64: 128, 128>}, {pipeline_mode = #tpu.pipeline_mode<synchronous>, transform_indices = @transform_6, window_bounds = array<i64: 1, 128>}, {transform_indices = @transform_7, window_bounds = array<i64: 8, 128>}]} {
    %c0 = arith.constant 0 : index
    %c0_0 = arith.constant 0 : index
    %0 = vector.load %arg1[%c0, %c0_0] : memref<8x32xf32, #tpu.memory_space<vmem>>, vector<8x32xf32>
    %c0_1 = arith.constant 0 : index
    %c0_2 = arith.constant 0 : index
    %1 = vector.load %arg2[%c0_1, %c0_2] : memref<32x128xf32, #tpu.memory_space<vmem>>, vector<32x128xf32>
    %cst = arith.constant dense<0.000000e+00> : vector<8x128xf32>
    %2 = tpu.matmul %0, %1, %cst {dimension_numbers = #tpu.dot_dimension_numbers<[1], [0], [0], [1], [0, 0, 1, 1], [], []>} : vector<8x32xf32>, vector<32x128xf32>, vector<8x128xf32> -> vector<8x128xf32>
    %c0_3 = arith.constant 0 : index
    %c0_4 = arith.constant 0 : index
    %3 = vector.load %arg3[%c0_3, %c0_4] : memref<1x128xf32, #tpu.memory_space<vmem>>, vector<1x128xf32>
    %4 = vector.broadcast %3 : vector<1x128xf32> to vector<8x128xf32>
    %5 = arith.addf %2, %4 : vector<8x128xf32>
    %cst_5 = arith.constant 0.000000e+00 : f32
    %6 = vector.broadcast %cst_5 : f32 to vector<8x128xf32>
    %7 = arith.maximumf %5, %6 : vector<8x128xf32>
    %c0_6 = arith.constant 0 : index
    %c0_7 = arith.constant 0 : index
    %8 = vector.load %arg4[%c0_6, %c0_7] : memref<128x128xf32, #tpu.memory_space<vmem>>, vector<128x128xf32>
    %cst_8 = arith.constant dense<0.000000e+00> : vector<8x128xf32>
    %9 = tpu.matmul %7, %8, %cst_8 {dimension_numbers = #tpu.dot_dimension_numbers<[1], [0], [0], [1], [0, 0, 1, 1], [], []>} : vector<8x128xf32>, vector<128x128xf32>, vector<8x128xf32> -> vector<8x128xf32>
    %c0_9 = arith.constant 0 : index
    %c0_10 = arith.constant 0 : index
    %10 = vector.load %arg5[%c0_9, %c0_10] : memref<1x128xf32, #tpu.memory_space<vmem>>, vector<1x128xf32>
    %11 = vector.broadcast %10 : vector<1x128xf32> to vector<8x128xf32>
    %12 = arith.addf %9, %11 : vector<8x128xf32>
    %cst_11 = arith.constant 0.000000e+00 : f32
    %13 = vector.broadcast %cst_11 : f32 to vector<8x128xf32>
    %14 = arith.maximumf %12, %13 : vector<8x128xf32>
    %c0_12 = arith.constant 0 : index
    %c0_13 = arith.constant 0 : index
    %15 = vector.load %arg6[%c0_12, %c0_13] : memref<128x128xf32, #tpu.memory_space<vmem>>, vector<128x128xf32>
    %cst_14 = arith.constant dense<0.000000e+00> : vector<8x128xf32>
    %16 = tpu.matmul %14, %15, %cst_14 {dimension_numbers = #tpu.dot_dimension_numbers<[1], [0], [0], [1], [0, 0, 1, 1], [], []>} : vector<8x128xf32>, vector<128x128xf32>, vector<8x128xf32> -> vector<8x128xf32>
    %c0_15 = arith.constant 0 : index
    %c0_16 = arith.constant 0 : index
    %17 = vector.load %arg7[%c0_15, %c0_16] : memref<1x128xf32, #tpu.memory_space<vmem>>, vector<1x128xf32>
    %18 = vector.broadcast %17 : vector<1x128xf32> to vector<8x128xf32>
    %19 = arith.addf %16, %18 : vector<8x128xf32>
    %c0_17 = arith.constant 0 : index
    %c0_18 = arith.constant 0 : index
    %20 = vector.load %arg8[%c0_17, %c0_18] : memref<8x128xf32, #tpu.memory_space<vmem>>, vector<8x128xf32>
    tpu.vector_store %arg8[%c0_17, %c0_18], %19 {strides = array<i32>} : memref<8x128xf32, #tpu.memory_space<vmem>>, vector<8x128xf32>,
    return
  }
  func.func @transform_0(%arg0: i32) -> (i32, i32) {
    %c0_i32 = arith.constant 0 : i32
    %c0_i32_0 = arith.constant 0 : i32
    return %arg0, %c0_i32 : i32, i32
  }
  func.func @transform_1(%arg0: i32) -> (i32, i32) {
    %c0_i32 = arith.constant 0 : i32
    %c0_i32_0 = arith.constant 0 : i32
    %c0_i32_1 = arith.constant 0 : i32
    return %c0_i32, %c0_i32_0 : i32, i32
  }
  func.func @transform_2(%arg0: i32) -> (i32, i32) {
    %c0_i32 = arith.constant 0 : i32
    %c0_i32_0 = arith.constant 0 : i32
    %c0_i32_1 = arith.constant 0 : i32
    return %c0_i32, %c0_i32_0 : i32, i32
  }
  func.func @transform_3(%arg0: i32) -> (i32, i32) {
    %c0_i32 = arith.constant 0 : i32
    %c0_i32_0 = arith.constant 0 : i32
    %c0_i32_1 = arith.constant 0 : i32
    return %c0_i32, %c0_i32_0 : i32, i32
  }
  func.func @transform_4(%arg0: i32) -> (i32, i32) {
    %c0_i32 = arith.constant 0 : i32
    %c0_i32_0 = arith.constant 0 : i32
    %c0_i32_1 = arith.constant 0 : i32
    return %c0_i32, %c0_i32_0 : i32, i32
  }
  func.func @transform_5(%arg0: i32) -> (i32, i32) {
    %c0_i32 = arith.constant 0 : i32
    %c0_i32_0 = arith.constant 0 : i32
    %c0_i32_1 = arith.constant 0 : i32
    return %c0_i32, %c0_i32_0 : i32, i32
  }
  func.func @transform_6(%arg0: i32) -> (i32, i32) {
    %c0_i32 = arith.constant 0 : i32
    %c0_i32_0 = arith.constant 0 : i32
    %c0_i32_1 = arith.constant 0 : i32
    return %c0_i32, %c0_i32_0 : i32, i32
  }
  func.func @transform_7(%arg0: i32) -> (i32, i32) {
    %c0_i32 = arith.constant 0 : i32
    %c0_i32_0 = arith.constant 0 : i32
    return %arg0, %c0_i32 : i32, i32
  }
}

</mosaic_0001>

<bundles_post_ra>
// kernel: tpu_custom_call.1
= control target key start
LH: loop header
LB: loop body
LE: loop exit
PB: predicated region body
PF: predicated region fallthrough
CT: control target
= control target key end

     0   :  { %12 = vsyncpa [#allocation3], 0  ;;  %s827_s0 = inlined_call_operand.hbm [shape: f32[8,32], index: 0, kind: input, shape index: {}]   ;;  %s828_s1 = inlined_call_operand.hbm [shape: f32[32,128], index: 1, kind: input, shape index: {}]   ;;  %s829_s2 = inlined_call_operand.vmem [shape: f32[1,128], index: 2, kind: input, shape index: {}]   ;;  %s830_s3 = inlined_call_operand.hbm [shape: f32[128,128], index: 3, kind: input, shape index: {}]   ;;  %s831_s4 = inlined_call_operand.vmem [shape: f32[1,128], index: 4, kind: input, shape index: {}]   ;;  %s832_s5 = inlined_call_operand.hbm [shape: f32[128,128], index: 5, kind: input, shape index: {}]   ;;  %s833_s6 = inlined_call_operand.vmem [shape: f32[1,128], index: 6, kind: input, shape index: {}]   ;;  %s834_s7 = inlined_call_operand.hbm [shape: f32[8,128], index: 7, kind: output, shape index: {}]  }
   0x1   :  { %13 = vsyncpa [#allocation6], 0 }
   0x2   :  { %14 = vsyncpa [#allocation9], 0 }
   0x3   :  { %15 = vsyncpa [#allocation4], 0  ;;  %s678_s24 = smov [#allocation5]   ;;  %s560_s28 = scalar_lea.hbm %s828_s1, 512 }
   0x4   :  { %s31_s25 = sshll.u32 %s678_s24, 4  ;;  %p561_p0 = scmp.ne.s32.totalorder %s828_s1, %s560_s28  ;;  %s32_s25 = int_to_ptr.vmem [resolvable:$true] %s31_s25 }
   0x5   :  { %p564_p1 = scmp.lt.u32.totalorder %s560_s28, %s828_s1 }
   0x7   :  { %p566_p2 = pnand %p564_p1, %p561_p0 }
   0x9   :  { %569 = shalt.err (!%p566_p2)
}
   0xa   :  { %s570_s10 = scalar_lea.vmem %s32_s25, 512  ;;  %p575_p4 = scmp.lt.s32.totalorder %s32_s25, %s32_s25 }
   0xb   :  { %p571_p3 = scmp.ne.s32.totalorder %s32_s25, %s570_s10  ;;  %p576_p5 = scmp.lt.s32.totalorder %s570_s10, %s570_s10 }
   0xd   :  { %p577_p6 = por %p576_p5, %p575_p4 }
   0xf   :  { %p578_p7 = pnand %p577_p6, %p571_p3 }
  0x11   :  { %581 = shalt.err (!%p578_p7)
}
  0x12   :  { %s679_s11 = smov 128   ;;  %s680_s12 = smov 8  }
  0x13   :  { %37 = dma.hbm_to_vmem [thread:$0]  %s828_s1, 512, %s32_s25, [#allocation6], %s679_s11, %s679_s11, %s680_s12  }
  0x14   :  { %s681_s15 = smov [#allocation2]   ;;  %s682_s17 = smov [#allocation7]  }
  0x15   :  { %s22_s16 = sshll.u32 %s681_s15, 4  ;;  %s45_s18 = sshll.u32 %s682_s17, 4  ;;  %s23_s16 = int_to_ptr.vmem [resolvable:$true] %s22_s16  ;;  %s46_s18 = int_to_ptr.vmem [resolvable:$true] %s45_s18 }
  0x16   :  { %s582_s21 = scalar_lea.hbm %s827_s0, 128 }
  0x17   :  { %p583_p8 = scmp.ne.s32.totalorder %s827_s0, %s582_s21  ;;  %p586_p9 = scmp.lt.u32.totalorder %s582_s21, %s827_s0 }
  0x19   :  { %p588_p10 = pnand %p586_p9, %p583_p8 }
  0x1b   :  { %591 = shalt.err (!%p588_p10)
}
  0x1c   :  { %s592_s1 = scalar_lea.vmem %s23_s16, 128  ;;  %p597_p12 = scmp.lt.s32.totalorder %s23_s16, %s23_s16 }
  0x1d   :  { %p593_p11 = scmp.ne.s32.totalorder %s23_s16, %s592_s1  ;;  %p598_p13 = scmp.lt.s32.totalorder %s592_s1, %s592_s1 }
  0x1f   :  { %p599_p0 = por %p598_p13, %p597_p12 }
  0x21   :  { %p600_p1 = pnand %p599_p0, %p593_p11 }
  0x23   :  { %603 = shalt.err (!%p600_p1)
}
  0x24   :  { %25 = dma.hbm_to_vmem [thread:$0]  %s827_s0, 128, %s23_s16, [#allocation3]  }
  0x25   :  { %s604_s30 = scalar_lea.hbm %s830_s3, 2048 }
  0x26   :  { %p605_p2 = scmp.ne.s32.totalorder %s830_s3, %s604_s30  ;;  %p608_p3 = scmp.lt.u32.totalorder %s604_s30, %s830_s3 }
  0x28   :  { %p610_p4 = pnand %p608_p3, %p605_p2 }
  0x2a   :  { %613 = shalt.err (!%p610_p4)
}
  0x2b   :  { %s614_s14 = scalar_lea.vmem %s46_s18, 2048  ;;  %p619_p6 = scmp.lt.s32.totalorder %s46_s18, %s46_s18 }
  0x2c   :  { %p615_p5 = scmp.ne.s32.totalorder %s46_s18, %s614_s14  ;;  %p620_p7 = scmp.lt.s32.totalorder %s614_s14, %s614_s14 }
  0x2e   :  { %p621_p8 = por %p620_p7, %p619_p6 }
  0x30   :  { %p622_p9 = pnand %p621_p8, %p615_p5 }
  0x32   :  { %625 = shalt.err (!%p622_p9)
}
  0x33   :  { %51 = dma.hbm_to_vmem [thread:$0]  %s830_s3, 2048, %s46_s18, [#allocation6], %s679_s11, %s679_s11, %s680_s12  }
  0x34   :  { %s683_s16 = smov [#allocation8]   ;;  %s626_s21 = scalar_lea.hbm %s832_s5, 2048 }
  0x35   :  { %s59_s17 = sshll.u32 %s683_s16, 4  ;;  %p627_p10 = scmp.ne.s32.totalorder %s832_s5, %s626_s21  ;;  %s60_s17 = int_to_ptr.vmem [resolvable:$true] %s59_s17 }
  0x36   :  { %p630_p11 = scmp.lt.u32.totalorder %s626_s21, %s832_s5 }
  0x38   :  { %p632_p12 = pnand %p630_p11, %p627_p10 }
  0x3a   :  { %635 = shalt.err (!%p632_p12)
}
  0x3b   :  { %s636_s1 = scalar_lea.vmem %s60_s17, 2048  ;;  %p641_p0 = scmp.lt.s32.totalorder %s60_s17, %s60_s17 }
  0x3c   :  { %p637_p13 = scmp.ne.s32.totalorder %s60_s17, %s636_s1  ;;  %p642_p1 = scmp.lt.s32.totalorder %s636_s1, %s636_s1 }
  0x3e   :  { %p643_p2 = por %p642_p1, %p641_p0 }
  0x40   :  { %p644_p3 = pnand %p643_p2, %p637_p13 }
  0x42   :  { %647 = shalt.err (!%p644_p3)
}
  0x43   :  { %65 = dma.hbm_to_vmem [thread:$0]  %s832_s5, 2048, %s60_s17, [#allocation9], %s679_s11, %s679_s11, %s680_s12  }
  0x44   :  { %670 = dma.done.wait [#allocation3], 128  }
  0x45   :  { %671 = vsyncadd [#allocation3], 4294967168 }
  0x46   :  { %672 = dma.done.wait [#allocation6], 2560  }
  0x47   :  { %673 = vsyncadd [#allocation6], 4294964736 }
  0x48   :  { %674 = dma.done.wait [#allocation9], 2048  }
  0x49   :  { %675 = vsyncadd [#allocation9], 4294965248  ;;  %v684_v0 = vmov 0.0|0.0   ;;  %vm685_vm0 = vmmov 0   ;;  %v686_v1 = vmov 0.0   ;;  %v81_v2 = vld [vmem:[#allocation5] sm:$0xff] }
  0x4a   :  { %496 = vmatprep.subr.bf16.mxu0 %v684_v0  ;;  %423 = vmatprep.mubr.msk.f32.mxu0 %vm685_vm0, %v686_v1  ;;  %v82_v3 = vld [vmem:[#allocation5 + $0x8] sm:$0xff]  ;;  %v83_v4 = vld [vmem:[#allocation5 + $0x10] sm:$0xff]  ;;  %v84_v6 = vld [vmem:[#allocation5 + $0x18] sm:$0xff]  ;;  %vm92_vm1 = vcmask 261120   ;;  %s687_s28 = smov [#allocation10]  }
  0x4b   :  { %502 = vmatprep.subr.bf16.mxu1 %v684_v0  ;;  %458 = vmatprep.mubr.msk.f32.mxu1 %vm685_vm0, %v686_v1  ;;  %v497_v5 = vpack.c.bf16 %v82_v3, %v81_v2  ;;  %v167_v7 = vld [vmem:[#allocation7] sm:$0xff]  ;;  %v168_v8 = vld [vmem:[#allocation7 + $0x8] sm:$0xff]  ;;  %v169_v9 = vld [vmem:[#allocation7 + $0x10] sm:$0xff]  ;;  %v500_v11 = vpack.c.bf16 %v84_v6, %v83_v4  ;;  %s361_s29 = sshll.u32 %s687_s28, 4  ;;  %s362_s29 = int_to_ptr.vmem [resolvable:$true] %s361_s29 }
  0x4c   :  { %v170_v10 = vld [vmem:[#allocation7 + $0x18] sm:$0xff]  ;;  %v503_v12 = vpack.c.bf16 %v168_v8, %v167_v7  ;;  %v171_v14 = vld [vmem:[#allocation7 + $0x20] sm:$0xff]  ;;  %v172_v15 = vld [vmem:[#allocation7 + $0x28] sm:$0xff]  ;;  %s648_s30 = scalar_lea.vmem %s362_s29, 128  ;;  %p653_p5 = scmp.lt.s32.totalorder %s362_s29, %s362_s29 }
  0x4d   :  { %498 = vmatpush3.bf16.msra.mxu0 %v497_v5  ;;  %v506_v13 = vpack.c.bf16 %v170_v10, %v169_v9  ;;  %v80_v16 = vld [vmem:[#allocation2] sm:$0xff]  ;;  %v509_v17 = vpack.c.bf16 %v172_v15, %v171_v14  ;;  %v173_v18 = vld [vmem:[#allocation7 + $0x30] sm:$0xff]  ;;  %v175_v21 = vld [vmem:[#allocation7 + $0x40] sm:$0xff]  ;;  %p649_p4 = scmp.ne.s32.totalorder %s362_s29, %s648_s30  ;;  %p654_p6 = scmp.lt.s32.totalorder %s648_s30, %s648_s30 }
  0x4e   :  { %499 = vmatprep.subr.bf16.mxu0 %v684_v0  ;;  %504 = vmatpush3.bf16.msra.mxu1 %v503_v12  ;;  %v174_v19 = vld [vmem:[#allocation7 + $0x38] sm:$0xff]  ;;  %v176_v22 = vld [vmem:[#allocation7 + $0x48] sm:$0xff]  ;;  %v177_v24 = vld [vmem:[#allocation7 + $0x50] sm:$0xff] }
  0x4f   :  { %505 = vmatprep.subr.bf16.mxu1 %v684_v0  ;;  %v512_v20 = vpack.c.bf16 %v174_v19, %v173_v18  ;;  %v515_v23 = vpack.c.bf16 %v176_v22, %v175_v21  ;;  %v178_v25 = vld [vmem:[#allocation7 + $0x58] sm:$0xff]  ;;  %v179_v27 = vld [vmem:[#allocation7 + $0x60] sm:$0xff]  ;;  %v180_v28 = vld [vmem:[#allocation7 + $0x68] sm:$0xff]  ;;  %p655_p7 = por %p654_p6, %p653_p5 }
  0x50   :  { %v518_v26 = vpack.c.bf16 %v178_v25, %v177_v24  ;;  %v521_v29 = vpack.c.bf16 %v180_v28, %v179_v27  ;;  %v181_v30 = vld [vmem:[#allocation7 + $0x70] sm:$0xff]  ;;  %v182_v31 = vld [vmem:[#allocation7 + $0x78] sm:$0xff]  ;;  %v261_v33 = vld [vmem:[#allocation8] sm:$0xff] }
  0x51   :  { %501 = vmatpush3.bf16.msra.mxu0 %v500_v11  ;;  %v524_v32 = vpack.c.bf16 %v182_v31, %v181_v30  ;;  %v262_v34 = vld [vmem:[#allocation8 + $0x8] sm:$0xff]  ;;  %v263_v35 = vld [vmem:[#allocation8 + $0x10] sm:$0xff]  ;;  %v264_v37 = vld [vmem:[#allocation8 + $0x18] sm:$0xff]  ;;  %p656_p8 = pnand %p655_p7, %p649_p4 }
  0x52   :  { %526 = vmatprep.subr.bf16.mxu0 %v684_v0  ;;  %507 = vmatpush3.bf16.msra.mxu1 %v506_v13  ;;  %v527_v36 = vpack.c.bf16 %v262_v34, %v261_v33  ;;  %v530_v38 = vpack.c.bf16 %v264_v37, %v263_v35  ;;  %v265_v39 = vld [vmem:[#allocation8 + $0x20] sm:$0xff]  ;;  %v266_v40 = vld [vmem:[#allocation8 + $0x28] sm:$0xff]  ;;  %v267_v42 = vld [vmem:[#allocation8 + $0x30] sm:$0xff] }
  0x53   :  { %508 = vmatprep.subr.bf16.mxu1 %v684_v0  ;;  %v533_v41 = vpack.c.bf16 %v266_v40, %v265_v39  ;;  %v268_v43 = vld [vmem:[#allocation8 + $0x38] sm:$0xff]  ;;  %v269_v45 = vld [vmem:[#allocation8 + $0x40] sm:$0xff]  ;;  %v270_v46 = vld [vmem:[#allocation8 + $0x48] sm:$0xff] }
  0x54   :  { %424 = vmatmul.mubr.msk.f32.vlgmr.msra.gmra.mrb[0].mxu0 %vm92_vm1, %v80_v16  ;;  %v536_v44 = vpack.c.bf16 %v268_v43, %v267_v42  ;;  %v539_v47 = vpack.c.bf16 %v270_v46, %v269_v45  ;;  %v271_v48 = vld [vmem:[#allocation8 + $0x50] sm:$0xff]  ;;  %v272_v49 = vld [vmem:[#allocation8 + $0x58] sm:$0xff]  ;;  %v273_v51 = vld [vmem:[#allocation8 + $0x60] sm:$0xff] }
  0x55   :  { %493 = vmatprep.mubr.msk.f32.mxu0 %vm685_vm0, %v686_v1  ;;  %528 = vmatpush3.bf16.msra.mxu0 %v527_v36  ;;  %v542_v50 = vpack.c.bf16 %v272_v49, %v271_v48  ;;  %v274_v52 = vld [vmem:[#allocation8 + $0x68] sm:$0xff]  ;;  %v372_v54 = vld [vmem:[%s829_s2] ss:$0 sm:$0xff]  ;;  %v275_v59 = vld [vmem:[#allocation8 + $0x70] sm:$0xff] }
  0x56   :  { %510 = vmatpush3.bf16.msra.mxu1 %v509_v17  ;;  %529 = vmatprep.subr.bf16.mxu0 %v684_v0  ;;  %v545_v53 = vpack.c.bf16 %v274_v52, %v273_v51  ;;  %v276_v60 = vld [vmem:[#allocation8 + $0x78] sm:$0xff] }
  0x57   :  { %511 = vmatprep.subr.bf16.mxu1 %v684_v0  ;;  %v548_v61 = vpack.c.bf16 %v276_v60, %v275_v59  ;;  %v374_v62 = vld [vmem:[%s831_s4] ss:$0 sm:$0xff] }
  0x58   :  { %v375_v3 = vld [vmem:[%s833_s6] ss:$0 sm:$0xff] }
  0x59   :  { %531 = vmatpush3.bf16.msra.mxu0 %v530_v38 }
  0x5a   :  { %513 = vmatpush3.bf16.msra.mxu1 %v512_v20  ;;  %532 = vmatprep.subr.bf16.mxu0 %v684_v0 }
  0x5b   :  { %514 = vmatprep.subr.bf16.mxu1 %v684_v0 }
  0x5d   :  { %534 = vmatpush3.bf16.msra.mxu0 %v533_v41 }
  0x5e   :  { %516 = vmatpush3.bf16.msra.mxu1 %v515_v23  ;;  %535 = vmatprep.subr.bf16.mxu0 %v684_v0 }
  0x5f   :  { %517 = vmatprep.subr.bf16.mxu1 %v684_v0 }
  0x61   :  { %537 = vmatpush3.bf16.msra.mxu0 %v536_v44 }
  0x62   :  { %519 = vmatpush3.bf16.msra.mxu1 %v518_v26  ;;  %538 = vmatprep.subr.bf16.mxu0 %v684_v0 }
  0x63   :  { %520 = vmatprep.subr.bf16.mxu1 %v684_v0 }
  0x65   :  { %540 = vmatpush3.bf16.msra.mxu0 %v539_v47 }
  0x66   :  { %522 = vmatpush3.bf16.msra.mxu1 %v521_v29  ;;  %541 = vmatprep.subr.bf16.mxu0 %v684_v0 }
  0x67   :  { %523 = vmatprep.subr.bf16.mxu1 %v684_v0 }
  0x69   :  { %543 = vmatpush3.bf16.msra.mxu0 %v542_v50 }
  0x6a   :  { %525 = vmatpush3.bf16.msra.mxu1 %v524_v32  ;;  %544 = vmatprep.subr.bf16.mxu0 %v684_v0 }
  0x6d   :  { %546 = vmatpush3.bf16.msra.mxu0 %v545_v53 }
  0x6e   :  { %547 = vmatprep.subr.bf16.mxu0 %v684_v0 }
  0x71   :  { %549 = vmatpush3.bf16.msra.mxu0 %v548_v61 }
 0x127   :  { %v162_v55 = vpop.f32.mrb[0].mxu0 }
 0x128   :  { %v163_v56 = vadd.f32 %v372_v54, %v162_v55  ;;  %v425_v57 = vpop.f32.mrb[1].mxu0 }
 0x12a   :  { %v166_v58 = vmax.f32 %v163_v56, 0.0 }
 0x12c   :  { %459 = vmatmul.mubr.f32.vlgmr.msra.gmra.mrb[0].mxu1 %v166_v58 }
 0x1ff   :  { %v256_v63 = vpop.f32.mrb[0].mxu1 }
 0x200   :  { %v257_v1 = vadd.f32 %v374_v62, %v256_v63  ;;  %v460_v0 = vpop.f32.mrb[1].mxu1 }
 0x202   :  { %v260_v2 = vmax.f32 %v257_v1, 0.0 }
 0x204   :  { %494 = vmatmul.mubr.f32.vlgmr.msra.gmra.mrb[2].mxu0 %v260_v2 }
 0x2d7   :  { %v350_v4 = vpop.f32.mrb[2].mxu0 }
 0x2d8   :  { %v351_v5 = vadd.f32 %v375_v3, %v350_v4  ;;  %v495_v6 = vpop.f32.mrb[3].mxu0 }
 0x2da   :  { %354 = vst [vmem:[#allocation10] sm:$0xff] %v351_v5 }
 0x2db   :  { %659 = shalt.err (!%p656_p8)
}
 0x2dc   :  { %s660_s9 = scalar_lea.hbm %s834_s7, 128 }
 0x2dd   :  { %p661_p9 = scmp.ne.s32.totalorder %s834_s7, %s660_s9  ;;  %p664_p10 = scmp.lt.u32.totalorder %s660_s9, %s834_s7 }
 0x2df   :  { %p666_p11 = pnand %p664_p10, %p661_p9 }
 0x2e1   :  { %669 = shalt.err (!%p666_p11)
}
 0x2e2   :  { %364 = dma.vmem_to_hbm [thread:$0]  %s362_s29, 128, %s834_s7, [#allocation4]  }
 0x2e3   :  { %676 = dma.done.wait [#allocation4], 128  }
 0x2e4   :  { %677 = vsyncadd [#allocation4], 4294967168 }
 0x2e5   :  { %368 = vsyncpa [#allocation3], 1 }
 0x2e6   :  { %369 = vsyncpa [#allocation6], 1 }
 0x2e7   :  { %370 = vsyncpa [#allocation9], 1 }
 0x2e8   :  { %371 = vsyncpa [#allocation4], 1 }

</bundles_post_ra>
